<compile_context>
chip_gen: v7x
topology: tpu7x:2x2x1
jax: 0.10.0
libtpu: 0.0.40
codegen_flags: <defaults>
</compile_context>

<pallas_src>
import functools

import jax
import jax.numpy as jnp
from jax.experimental import pallas as pl
from jax.experimental.pallas import tpu as pltpu


# ----------------------------- model config ---------------------------------
VOCAB_SIZE = 256        # synthetic vocab (GPT-2 tokenizer is an external asset)
EMBED_DIM = 64
NUM_HEADS = 4
HEAD_DIM = EMBED_DIM // NUM_HEADS
# TODO(synk): at a real vocab size (~50k) the one-hot embedding matmul and the
# untiled lm_head no longer make sense - switch to a scalar-prefetch row gather
# for the embedding and tile the lm_head over V with a grid axis.


# ------------------------------ Pallas kernel -------------------------------
def tiny_transformer_kernel(
    tok_ref,       # (bb*T, 1)     int32
    emb_ref,       # (V, C)        bf16
    wqkv_ref,      # (C, 3C)       bf16  (1/sqrt(d_k) folded into the Q columns)
    bqkv_ref,      # (1, 3C)       f32
    wol_ref,       # (C, V)        bf16  (= wo @ wl, folded)
    bol_ref,       # (1, V)        f32   (= bo @ wl + bl, folded)
    logits_ref,    # (bb, T, V)    f32
    attn_ref,      # (bb, H, T, T) f32
):
    bb, H, T, _ = attn_ref.shape
    V, C = emb_ref.shape
    D = C // H
    N = bb * T

    # ---- fused embedding: one-hot (N, V) @ emb (V, C) on the MXU ------------
    tok = tok_ref[...]                                               # (N, 1) int32
    iota_v = jax.lax.broadcasted_iota(jnp.int32, (N, V), 1)
    onehot = jnp.where(iota_v == tok, 1.0, 0.0).astype(jnp.bfloat16)  # (N, V)
    xb = jnp.dot(onehot, emb_ref[...],
                 preferred_element_type=jnp.float32).astype(jnp.bfloat16)   # (N, C)

    # ---- fused Q/K/V projection: ONE (N, C) @ (C, 3C) matmul ----------------
    qkv = jnp.dot(xb, wqkv_ref[...],
                  preferred_element_type=jnp.float32) + bqkv_ref[...]       # (N, 3C)
    qkv = qkv.astype(jnp.bfloat16)                     # cast BEFORE the relayout

    # ---- single relayout to head-major layout for q, k, v together ----------
    qkv = qkv.reshape(bb, T, 3 * H, D)                 # columns = (which, head, dim)
    qkv = jnp.transpose(qkv, (0, 2, 1, 3))             # (bb, 3H, T, D) one relayout
    qkv = qkv.reshape(bb, 3, H, T, D)                  # major-axis split (free)
    qh = qkv[:, 0].reshape(bb * H, T, D)               # (bb*H, T, D)
    kh = qkv[:, 1].reshape(bb * H, T, D)
    vh = qkv[:, 2].reshape(bb * H, T, D)

    # ---- batched attention over all (batch, head) pairs at once -------------
    s = jnp.einsum("nqd,nkd->nqk", qh, kh,
                   preferred_element_type=jnp.float32)               # (bb*H, T, T)
    s = s - jnp.max(s, axis=-1, keepdims=True)
    e = jnp.exp(s)
    a = e * pl.reciprocal(jnp.sum(e, axis=-1, keepdims=True), approx=False)
    attn_ref[...] = a.reshape(bb, H, T, T).astype(attn_ref.dtype)

    o = jnp.einsum("nqk,nkd->nqd", a.astype(jnp.bfloat16), vh,
                   preferred_element_type=jnp.float32)               # (bb*H, T, D)

    # ---- merge heads: ONE transpose + reshape back to (N, C) ----------------
    ob = o.astype(jnp.bfloat16)                        # cast BEFORE the relayout
    y = jnp.transpose(ob.reshape(bb, H, T, D), (0, 2, 1, 3)).reshape(N, C)

    # ---- fc_out folded into lm_head ------------------------------------------
    logits = jnp.dot(y, wol_ref[...],
                     preferred_element_type=jnp.float32) + bol_ref[...]      # (N, V)
    logits_ref[...] = logits.reshape(bb, T, V).astype(logits_ref.dtype)


# ------------------------------- wrappers ------------------------------------
def prepare_params(params):
    """One-time weight prep OUTSIDE jit:
    transpose PyTorch (out,in) -> (in,out), fold 1/sqrt(d_k) into the Q columns,
    fuse Q/K/V into a single (C, 3C) weight, fold fc_out into lm_head
    (wol = wo @ wl, bol = bo @ wl + bl), cast MXU operands to bf16,
    keep biases f32 with shape (1, out)."""
    inv_sqrt_dk = 1.0 / (HEAD_DIM ** 0.5)
    wq_t = params["wq"].T * inv_sqrt_dk                          # (C, C)
    wk_t = params["wk"].T
    wv_t = params["wv"].T
    wqkv = jnp.concatenate([wq_t, wk_t, wv_t], axis=1)           # (C, 3C)
    bqkv = jnp.concatenate(
        [params["bq"] * inv_sqrt_dk, params["bk"], params["bv"]])  # (3C,)

    wo_t = params["wo"].T                                        # (C, C)
    wl_t = params["wl"].T                                        # (C, V)
    wol = wo_t @ wl_t                                            # (C, V) folded in f32
    bol = params["bo"] @ wl_t + params["bl"]                     # (V,)

    return {
        "emb": params["emb"].astype(jnp.bfloat16),
        "wqkv": wqkv.astype(jnp.bfloat16),
        "bqkv": bqkv[None, :].astype(jnp.float32),
        "wol": wol.astype(jnp.bfloat16),
        "bol": bol[None, :].astype(jnp.float32),
    }


def _full_spec(shape):
    n = len(shape)
    return pl.BlockSpec(shape, lambda i, n=n: (0,) * n)


@functools.partial(jax.jit, static_argnames=("batch_blocks",))
def _forward(tokens, prepped, *, batch_blocks):
    """tokens: (B, T) int32. Returns (logits (B,T,V) f32, attn (B,H,T,T) f32)."""
    B, T = tokens.shape
    C, V, H = EMBED_DIM, VOCAB_SIZE, NUM_HEADS
    nb = batch_blocks                 # grid size (1 on v5e/v6e, B on v7x)
    bb = B // nb                      # batches handled per grid step
    tok = tokens.reshape(B * T, 1).astype(jnp.int32)

    grid_spec = pltpu.PrefetchScalarGridSpec(
        num_scalar_prefetch=0,
        grid=(nb,),
        in_specs=[
            pl.BlockSpec((bb * T, 1), lambda i: (i, 0)),          # tokens
            _full_spec((V, C)),                                   # embedding table
            _full_spec((C, 3 * C)), _full_spec((1, 3 * C)),       # wqkv, bqkv
            _full_spec((C, V)), _full_spec((1, V)),               # wol, bol
        ],
        out_specs=[
            pl.BlockSpec((bb, T, V), lambda i: (i, 0, 0)),        # logits
            pl.BlockSpec((bb, H, T, T), lambda i: (i, 0, 0, 0)),  # attention weights
        ],
    )

    logits, attn = pl.pallas_call(
        tiny_transformer_kernel,
        out_shape=(
            jax.ShapeDtypeStruct((B, T, V), jnp.float32),
            jax.ShapeDtypeStruct((B, H, T, T), jnp.float32),
        ),
        grid_spec=grid_spec,
        compiler_params=pltpu.CompilerParams(
            dimension_semantics=("parallel",),
        ),
    )(tok, prepped["emb"], prepped["wqkv"], prepped["bqkv"],
      prepped["wol"], prepped["bol"])
    return logits, attn


def _num_batch_blocks(batch):
    """Batch-parallel grid only on dual-TensorCore chips (v7x); otherwise 1."""
    try:
        kind = jax.devices()[0].device_kind.lower()
    except Exception:
        return 1
    return batch if ("v7" in kind or "7x" in kind) else 1


def tiny_transformer_forward(tokens, prepped):
    return _forward(tokens, prepped,
                    batch_blocks=_num_batch_blocks(tokens.shape[0]))


# -------------------------- deterministic params -----------------------------
def init_params(key):
    C, V = EMBED_DIM, VOCAB_SIZE
    ks = jax.random.split(key, 6)
    scale = 0.02
    return {
        "emb": scale * jax.random.normal(ks[0], (V, C), jnp.float32),
        "wq": scale * jax.random.normal(ks[1], (C, C), jnp.float32),
        "bq": jnp.zeros((C,), jnp.float32),
        "wk": scale * jax.random.normal(ks[2], (C, C), jnp.float32),
        "bk": jnp.zeros((C,), jnp.float32),
        "wv": scale * jax.random.normal(ks[3], (C, C), jnp.float32),
        "bv": jnp.zeros((C,), jnp.float32),
        "wo": scale * jax.random.normal(ks[4], (C, C), jnp.float32),
        "bo": jnp.zeros((C,), jnp.float32),
        "wl": scale * jax.random.normal(ks[5], (V, C), jnp.float32),  # PyTorch (out,in)
        "bl": jnp.zeros((V,), jnp.float32),
    }


# -------------------------- pure-JAX f32 reference ----------------------------
def reference_forward(tokens, params):
    x = jnp.take(params["emb"], tokens, axis=0)                       # (B,T,C)
    B, T, C = x.shape
    H, D = NUM_HEADS, HEAD_DIM
    lin = lambda x, w, b: x @ w.T + b
    q = lin(x, params["wq"], params["bq"]).reshape(B, T, H, D).transpose(0, 2, 1, 3)
    k = lin(x, params["wk"], params["bk"]).reshape(B, T, H, D).transpose(0, 2, 1, 3)
    v = lin(x, params["wv"], params["bv"]).reshape(B, T, H, D).transpose(0, 2, 1, 3)
    scores = jnp.einsum("bhqd,bhkd->bhqk", q, k) / (D ** 0.5)
    attn = jax.nn.softmax(scores, axis=-1)
    out = jnp.einsum("bhqk,bhkd->bhqd", attn, v).transpose(0, 2, 1, 3).reshape(B, T, C)
    out = lin(out, params["wo"], params["bo"])
    logits = lin(out, params["wl"], params["bl"])
    return logits, attn


# ----------------------------------- main -------------------------------------
if __name__ == "__main__":
    key = jax.random.PRNGKey(0)
    pkey, tkey = jax.random.split(key)

    params = init_params(pkey)
    prepped = prepare_params(params)     # one-time prep, outside jit

    B, T = 2, 8
    tokens = jax.random.randint(tkey, (B, T), 0, VOCAB_SIZE, dtype=jnp.int32)

    logits, attn = tiny_transformer_forward(tokens, prepped)
    logits = jax.block_until_ready(logits)
    attn = jax.block_until_ready(attn)

    # correctness check against the pure-f32 reference (tolerances account for
    # bf16 MXU operands with f32 accumulation and the folded wo@wl rounding)
    ref_logits, ref_attn = reference_forward(tokens, params)
    assert logits.shape == (B, T, VOCAB_SIZE)
    assert attn.shape == (B, NUM_HEADS, T, T)
    assert jnp.allclose(logits, ref_logits, atol=2e-3, rtol=2e-2), \
        float(jnp.max(jnp.abs(logits - ref_logits)))
    assert jnp.allclose(attn, ref_attn, atol=2e-3, rtol=2e-2), \
        float(jnp.max(jnp.abs(attn - ref_attn)))

    print("KERNEL_OK")
</pallas_src>

<mosaic_0001>
module attributes {stable_mosaic.version = 11 : i64} {
  func.func @tiny_transformer_kernel(%arg0: i32, %arg1: memref<16x1xi32, #tpu.memory_space<vmem>>, %arg2: memref<256x64xbf16, #tpu.memory_space<vmem>>, %arg3: memref<64x192xbf16, #tpu.memory_space<vmem>>, %arg4: memref<1x192xf32, #tpu.memory_space<vmem>>, %arg5: memref<64x256xbf16, #tpu.memory_space<vmem>>, %arg6: memref<1x256xf32, #tpu.memory_space<vmem>>, %arg7: memref<2x8x256xf32, #tpu.memory_space<vmem>>, %arg8: memref<2x4x8x8xf32, #tpu.memory_space<vmem>>) attributes {dimension_semantics = [#tpu.dimension_semantics<parallel>], iteration_bounds = array<i64: 1>, scalar_prefetch = 0 : i64, scratch_operands = 0 : i64, tpu.core_type = #tpu.core_type<tc>, window_params = [{transform_indices = @transform_0, window_bounds = array<i64: 16, 1>}, {pipeline_mode = #tpu.pipeline_mode<synchronous>, transform_indices = @transform_1, window_bounds = array<i64: 256, 64>}, {pipeline_mode = #tpu.pipeline_mode<synchronous>, transform_indices = @transform_2, window_bounds = array<i64: 64, 192>}, {pipeline_mode = #tpu.pipeline_mode<synchronous>, transform_indices = @transform_3, window_bounds = array<i64: 1, 192>}, {pipeline_mode = #tpu.pipeline_mode<synchronous>, transform_indices = @transform_4, window_bounds = array<i64: 64, 256>}, {pipeline_mode = #tpu.pipeline_mode<synchronous>, transform_indices = @transform_5, window_bounds = array<i64: 1, 256>}, {transform_indices = @transform_6, window_bounds = array<i64: 2, 8, 256>}, {transform_indices = @transform_7, window_bounds = array<i64: 2, 4, 8, 8>}]} {
    %c0 = arith.constant 0 : index
    %c0_0 = arith.constant 0 : index
    %0 = vector.load %arg1[%c0, %c0_0] : memref<16x1xi32, #tpu.memory_space<vmem>>, vector<16x1xi32>
    %1 = tpu.iota {dimensions = array<i32: 1>} : vector<16x256xi32>
    %2 = vector.broadcast %0 : vector<16x1xi32> to vector<16x256xi32>
    %3 = arith.cmpi eq, %1, %2 : vector<16x256xi32>
    %cst = arith.constant 1.000000e+00 : f32
    %cst_1 = arith.constant 0.000000e+00 : f32
    %4 = vector.broadcast %cst : f32 to vector<16x256xf32>
    %5 = vector.broadcast %cst_1 : f32 to vector<16x256xf32>
    %6 = arith.select %3, %4, %5 : vector<16x256xi1>, vector<16x256xf32>
    %7 = arith.truncf %6 : vector<16x256xf32> to vector<16x256xbf16>
    %c0_2 = arith.constant 0 : index
    %c0_3 = arith.constant 0 : index
    %8 = vector.load %arg2[%c0_2, %c0_3] : memref<256x64xbf16, #tpu.memory_space<vmem>>, vector<256x64xbf16>
    %cst_4 = arith.constant dense<0.000000e+00> : vector<16x64xf32>
    %9 = tpu.matmul %7, %8, %cst_4 {dimension_numbers = #tpu.dot_dimension_numbers<[1], [0], [0], [1], [0, 0, 1, 1], [], []>} : vector<16x256xbf16>, vector<256x64xbf16>, vector<16x64xf32> -> vector<16x64xf32>
    %10 = arith.truncf %9 : vector<16x64xf32> to vector<16x64xbf16>
    %c0_5 = arith.constant 0 : index
    %c0_6 = arith.constant 0 : index
    %11 = vector.load %arg3[%c0_5, %c0_6] : memref<64x192xbf16, #tpu.memory_space<vmem>>, vector<64x192xbf16>
    %cst_7 = arith.constant dense<0.000000e+00> : vector<16x192xf32>
    %12 = tpu.matmul %10, %11, %cst_7 {dimension_numbers = #tpu.dot_dimension_numbers<[1], [0], [0], [1], [0, 0, 1, 1], [], []>} : vector<16x64xbf16>, vector<64x192xbf16>, vector<16x192xf32> -> vector<16x192xf32>
    %c0_8 = arith.constant 0 : index
    %c0_9 = arith.constant 0 : index
    %13 = vector.load %arg4[%c0_8, %c0_9] : memref<1x192xf32, #tpu.memory_space<vmem>>, vector<1x192xf32>
    %14 = vector.broadcast %13 : vector<1x192xf32> to vector<16x192xf32>
    %15 = arith.addf %12, %14 : vector<16x192xf32>
    %16 = arith.truncf %15 : vector<16x192xf32> to vector<16x192xbf16>
    %17 = vector.shape_cast %16 : vector<16x192xbf16> to vector<2x8x12x16xbf16>
    %18 = tpu.transpose %17, [0, 2, 1, 3] : vector<2x8x12x16xbf16> -> vector<2x12x8x16xbf16>
    %19 = vector.shape_cast %18 : vector<2x12x8x16xbf16> to vector<2x3x4x8x16xbf16>
    %20 = vector.extract_strided_slice %19 {offsets = [0, 0, 0, 0, 0], sizes = [2, 1, 4, 8, 16], strides = [1, 1, 1, 1, 1]} : vector<2x3x4x8x16xbf16> to vector<2x1x4x8x16xbf16>
    %21 = vector.shape_cast %20 : vector<2x1x4x8x16xbf16> to vector<2x4x8x16xbf16>
    %22 = vector.shape_cast %21 : vector<2x4x8x16xbf16> to vector<8x8x16xbf16>
    %23 = vector.extract_strided_slice %19 {offsets = [0, 1, 0, 0, 0], sizes = [2, 1, 4, 8, 16], strides = [1, 1, 1, 1, 1]} : vector<2x3x4x8x16xbf16> to vector<2x1x4x8x16xbf16>
    %24 = vector.shape_cast %23 : vector<2x1x4x8x16xbf16> to vector<2x4x8x16xbf16>
    %25 = vector.shape_cast %24 : vector<2x4x8x16xbf16> to vector<8x8x16xbf16>
    %26 = vector.extract_strided_slice %19 {offsets = [0, 2, 0, 0, 0], sizes = [2, 1, 4, 8, 16], strides = [1, 1, 1, 1, 1]} : vector<2x3x4x8x16xbf16> to vector<2x1x4x8x16xbf16>
    %27 = vector.shape_cast %26 : vector<2x1x4x8x16xbf16> to vector<2x4x8x16xbf16>
    %28 = vector.shape_cast %27 : vector<2x4x8x16xbf16> to vector<8x8x16xbf16>
    "tpu.trace_start"() <{level = 10 : i32, message = "nqd,nkd->nqk"}> : () -> ()
    %cst_10 = arith.constant dense<0.000000e+00> : vector<8x8x8xf32>
    %29 = tpu.matmul %22, %25, %cst_10 {dimension_numbers = #tpu.dot_dimension_numbers<[2], [2], [1], [1], [0, 0, 0, 1, 1, 1], [0], [0]>} : vector<8x8x16xbf16>, vector<8x8x16xbf16>, vector<8x8x8xf32> -> vector<8x8x8xf32>
    "tpu.trace_stop"() : () -> ()
    %cst_11 = arith.constant dense<0xFF800000> : vector<8x8xf32>
    %30 = vector.multi_reduction <maximumf>, %29, %cst_11 [2] : vector<8x8x8xf32> to vector<8x8xf32>
    %31 = vector.shape_cast %30 : vector<8x8xf32> to vector<8x8x1xf32>
    %32 = vector.broadcast %31 : vector<8x8x1xf32> to vector<8x8x8xf32>
    %33 = arith.subf %29, %32 : vector<8x8x8xf32>
    %34 = math.exp %33 : vector<8x8x8xf32>
    %cst_12 = arith.constant dense<0.000000e+00> : vector<8x8xf32>
    %35 = vector.multi_reduction <add>, %34, %cst_12 [2] : vector<8x8x8xf32> to vector<8x8xf32>
    %36 = vector.shape_cast %35 : vector<8x8xf32> to vector<8x8x1xf32>
    %37 = tpu.reciprocal %36 : vector<8x8x1xf32> -> vector<8x8x1xf32>
    %38 = vector.broadcast %37 : vector<8x8x1xf32> to vector<8x8x8xf32>
    %39 = arith.mulf %34, %38 : vector<8x8x8xf32>
    %40 = vector.shape_cast %39 : vector<8x8x8xf32> to vector<2x4x8x8xf32>
    %c0_13 = arith.constant 0 : index
    %c0_14 = arith.constant 0 : index
    %c0_15 = arith.constant 0 : index
    %c0_16 = arith.constant 0 : index
    %41 = vector.load %arg8[%c0_13, %c0_14, %c0_15, %c0_16] : memref<2x4x8x8xf32, #tpu.memory_space<vmem>>, vector<2x4x8x8xf32>
    tpu.vector_store %arg8[%c0_13, %c0_14, %c0_15, %c0_16], %40 {strides = array<i32>} : memref<2x4x8x8xf32, #tpu.memory_space<vmem>>, vector<2x4x8x8xf32>,
    %42 = arith.truncf %39 : vector<8x8x8xf32> to vector<8x8x8xbf16>
    "tpu.trace_start"() <{level = 10 : i32, message = "nqk,nkd->nqd"}> : () -> ()
    %cst_17 = arith.constant dense<0.000000e+00> : vector<8x8x16xf32>
    %43 = tpu.matmul %42, %28, %cst_17 {dimension_numbers = #tpu.dot_dimension_numbers<[2], [1], [1], [2], [0, 0, 0, 1, 1, 2], [0], [0]>} : vector<8x8x8xbf16>, vector<8x8x16xbf16>, vector<8x8x16xf32> -> vector<8x8x16xf32>
    "tpu.trace_stop"() : () -> ()
    %44 = arith.truncf %43 : vector<8x8x16xf32> to vector<8x8x16xbf16>
    %45 = vector.shape_cast %44 : vector<8x8x16xbf16> to vector<2x4x8x16xbf16>
    %46 = tpu.transpose %45, [0, 2, 1, 3] : vector<2x4x8x16xbf16> -> vector<2x8x4x16xbf16>
    %47 = vector.shape_cast %46 : vector<2x8x4x16xbf16> to vector<16x64xbf16>
    %c0_18 = arith.constant 0 : index
    %c0_19 = arith.constant 0 : index
    %48 = vector.load %arg5[%c0_18, %c0_19] : memref<64x256xbf16, #tpu.memory_space<vmem>>, vector<64x256xbf16>
    %cst_20 = arith.constant dense<0.000000e+00> : vector<16x256xf32>
    %49 = tpu.matmul %47, %48, %cst_20 {dimension_numbers = #tpu.dot_dimension_numbers<[1], [0], [0], [1], [0, 0, 1, 1], [], []>} : vector<16x64xbf16>, vector<64x256xbf16>, vector<16x256xf32> -> vector<16x256xf32>
    %c0_21 = arith.constant 0 : index
    %c0_22 = arith.constant 0 : index
    %50 = vector.load %arg6[%c0_21, %c0_22] : memref<1x256xf32, #tpu.memory_space<vmem>>, vector<1x256xf32>
    %51 = vector.broadcast %50 : vector<1x256xf32> to vector<16x256xf32>
    %52 = arith.addf %49, %51 : vector<16x256xf32>
    %53 = vector.shape_cast %52 : vector<16x256xf32> to vector<2x8x256xf32>
    %c0_23 = arith.constant 0 : index
    %c0_24 = arith.constant 0 : index
    %c0_25 = arith.constant 0 : index
    %54 = vector.load %arg7[%c0_23, %c0_24, %c0_25] : memref<2x8x256xf32, #tpu.memory_space<vmem>>, vector<2x8x256xf32>
    tpu.vector_store %arg7[%c0_23, %c0_24, %c0_25], %53 {strides = array<i32>} : memref<2x8x256xf32, #tpu.memory_space<vmem>>, vector<2x8x256xf32>,
    return
  }
  func.func @transform_0(%arg0: i32) -> (i32, i32) {
    %c0_i32 = arith.constant 0 : i32
    %c0_i32_0 = arith.constant 0 : i32
    return %arg0, %c0_i32 : i32, i32
  }
  func.func @transform_1(%arg0: i32) -> (i32, i32) {
    %c0_i32 = arith.constant 0 : i32
    %c0_i32_0 = arith.constant 0 : i32
    %c0_i32_1 = arith.constant 0 : i32
    return %c0_i32, %c0_i32_0 : i32, i32
  }
  func.func @transform_2(%arg0: i32) -> (i32, i32) {
    %c0_i32 = arith.constant 0 : i32
    %c0_i32_0 = arith.constant 0 : i32
    %c0_i32_1 = arith.constant 0 : i32
    return %c0_i32, %c0_i32_0 : i32, i32
  }
  func.func @transform_3(%arg0: i32) -> (i32, i32) {
    %c0_i32 = arith.constant 0 : i32
    %c0_i32_0 = arith.constant 0 : i32
    %c0_i32_1 = arith.constant 0 : i32
    return %c0_i32, %c0_i32_0 : i32, i32
  }
  func.func @transform_4(%arg0: i32) -> (i32, i32) {
    %c0_i32 = arith.constant 0 : i32
    %c0_i32_0 = arith.constant 0 : i32
    %c0_i32_1 = arith.constant 0 : i32
    return %c0_i32, %c0_i32_0 : i32, i32
  }
  func.func @transform_5(%arg0: i32) -> (i32, i32) {
    %c0_i32 = arith.constant 0 : i32
    %c0_i32_0 = arith.constant 0 : i32
    %c0_i32_1 = arith.constant 0 : i32
    return %c0_i32, %c0_i32_0 : i32, i32
  }
  func.func @transform_6(%arg0: i32) -> (i32, i32, i32) {
    %c0_i32 = arith.constant 0 : i32
    %c0_i32_0 = arith.constant 0 : i32
    %c0_i32_1 = arith.constant 0 : i32
    return %arg0, %c0_i32, %c0_i32_0 : i32, i32, i32
  }
  func.func @transform_7(%arg0: i32) -> (i32, i32, i32, i32) {
    %c0_i32 = arith.constant 0 : i32
    %c0_i32_0 = arith.constant 0 : i32
    %c0_i32_1 = arith.constant 0 : i32
    %c0_i32_2 = arith.constant 0 : i32
    return %arg0, %c0_i32, %c0_i32_0, %c0_i32_1 : i32, i32, i32, i32
  }
}

</mosaic_0001>

<bundles_post_ra>
// kernel: _forward.1
= control target key start
LH: loop header
LB: loop body
LE: loop exit
PB: predicated region body
PF: predicated region fallthrough
CT: control target
= control target key end

     0   :  { %13 = vsyncpa [#allocation3], 0  ;;  %v2650_v1 = vmov 0   ;;  %s3157_s0 = inlined_call_operand.vmem [shape: s32[16,1], index: 0, kind: input, shape index: {}]   ;;  %s3158_s1 = inlined_call_operand.vmem [shape: bf16[256,64], index: 1, kind: input, shape index: {}]   ;;  %s3159_s2 = inlined_call_operand.vmem [shape: bf16[64,192], index: 2, kind: input, shape index: {}]   ;;  %s3160_s3 = inlined_call_operand.vmem [shape: f32[1,192], index: 3, kind: input, shape index: {}]   ;;  %s3161_s4 = inlined_call_operand.vmem [shape: bf16[64,256], index: 4, kind: input, shape index: {}]   ;;  %s3162_s5 = inlined_call_operand.vmem [shape: f32[1,256], index: 5, kind: input, shape index: {}]   ;;  %s3163_s6 = inlined_call_operand.hbm [shape: f32[2,8,256], index: 6, kind: output, shape index: {0}]   ;;  %s3164_s7 = inlined_call_operand.hbm [shape: f32[2,4,8,8], index: 7, kind: output, shape index: {1}]  }
   0x1   :  { %v28_v0 = vld [vmem:[%s3157_s0] sm:$0xff]  ;;  %2529 = vset.pattern.permute.xlu0 %v2650_v1  ;;  %v29_v2 = vld [vmem:[%s3157_s0 + $0x8] sm:$0xff]  ;;  %315 = vmatprep.mubr.bf16.mxu1 %v2650_v1  ;;  %v2534_v7 = vld [vmem:[%s3158_s1 + $0x50] sm:$0xff]  }
   0x2   :  { %v2530_v3 = vld [vmem:[%s3158_s1 + $0x40] sm:$0xff]   ;;  %34 = vperm.xlu0 %2529, %v28_v0   ;;  %v2532_v5 = vld [vmem:[%s3158_s1 + $0x48] sm:$0xff]   ;;  %v2535_v8 = vld [vmem:[%s3158_s1 + $0x10] sm:$0xff]  }
   0x3   :  { %v2531_v4 = vld [vmem:[%s3158_s1] sm:$0xff]   ;;  %2361 = vmatprep.subr.bf16.mxu0 %v2530_v3  ;;  %v2533_v6 = vld [vmem:[%s3158_s1 + $0x8] sm:$0xff]   ;;  %v2536_v9 = vld [vmem:[%s3158_s1 + $0x58] sm:$0xff]  }
   0x4   :  { %2362 = vmatpush3.bf16.msra.mxu0 %v2531_v4  ;;  %v2537_v10 = vld [vmem:[%s3158_s1 + $0x18] sm:$0xff]   ;;  %v2538_v11 = vld [vmem:[%s3158_s1 + $0x60] sm:$0xff]   ;;  %v2540_v13 = vld [vmem:[%s3158_s1 + $0x68] sm:$0xff]  }
   0x5   :  { %2363 = vmatprep.subr.bf16.mxu0 %v2532_v5  ;;  %v2539_v12 = vld [vmem:[%s3158_s1 + $0x20] sm:$0xff]   ;;  %v2541_v15 = vld [vmem:[%s3158_s1 + $0x28] sm:$0xff]   ;;  %v2542_v17 = vld [vmem:[%s3158_s1 + $0x70] sm:$0xff]  }
   0x6   :  { %37 = vperm.xlu0 %2529, %v29_v2   ;;  %v2546_v14 = vld [vmem:[%s3159_s2 + $0x4] ss:$8 sps:$4 sm:$0xff]   ;;  %v2548_v16 = vld [vmem:[%s3159_s2] ss:$8 sps:$4 sm:$0xff]   ;;  %v2549_v18 = vld [vmem:[%s3159_s2 + $0x14] ss:$8 sps:$4 sm:$0xff]  }
   0x7   :  { %283 = vmatprep.subr.bf16.mxu1 %v2546_v14  ;;  %v2551_v19 = vld [vmem:[%s3159_s2 + $0x10] ss:$8 sps:$4 sm:$0xff]  }
   0x8   :  { %2364 = vmatpush3.bf16.msra.mxu0 %v2533_v6  ;;  %284 = vmatpush1.bf16.msra.mxu1 %v2548_v16 }
   0x9   :  { %2365 = vmatprep.subr.bf16.mxu0 %v2534_v7  ;;  %285 = vmatprep.subr.bf16.mxu1 %v2549_v18 }
   0xc   :  { %2366 = vmatpush3.bf16.msra.mxu0 %v2535_v8 }
   0xd   :  { %2367 = vmatprep.subr.bf16.mxu0 %v2536_v9 }
  0x10   :  { %2368 = vmatpush3.bf16.msra.mxu0 %v2537_v10 }
  0x11   :  { %2369 = vmatprep.subr.bf16.mxu0 %v2538_v11 }
  0x14   :  { %2370 = vmatpush3.bf16.msra.mxu0 %v2539_v12 }
  0x15   :  { %2371 = vmatprep.subr.bf16.mxu0 %v2540_v13 }
  0x16   :  { %14 = vsyncpa [#allocation5], 0  ;;  %v2543_v20 = vld [vmem:[%s3158_s1 + $0x30] sm:$0xff]   ;;  %286 = vmatpush1.bf16.msra.mxu1 %v2551_v19  ;;  %v2544_v21 = vld [vmem:[%s3158_s1 + $0x78] sm:$0xff]   ;;  %v30_v23 = vlaneseq  ;;  %v2651_v28 = vmov 1.0|1.0  }
  0x17   :  { %v2545_v22 = vld [vmem:[%s3158_s1 + $0x38] sm:$0xff]   ;;  %v2552_v29 = vld [vmem:[%s3159_s2 + $0x24] ss:$8 sps:$4 sm:$0xff]   ;;  %v2554_v30 = vld [vmem:[%s3159_s2 + $0x20] ss:$8 sps:$4 sm:$0xff]   ;;  %vm279_vm6 = vcmask 523264  }
  0x18   :  { %2372 = vmatpush3.bf16.msra.mxu0 %v2541_v15  ;;  %v31_v24 = vand.u32 127, %v30_v23  ;;  %287 = vmatprep.subr.bf16.mxu1 %v2552_v29  ;;  %v2555_v31 = vld [vmem:[%s3159_s2 + $0x34] ss:$8 sps:$4 sm:$0xff]   ;;  %v2557_v32 = vld [vmem:[%s3159_s2 + $0x30] ss:$8 sps:$4 sm:$0xff]   ;;  %v2789_v40 = vshrl.u32 %v30_v23, 7 }
  0x19   :  { %2373 = vmatprep.subr.bf16.mxu0 %v2542_v17  ;;  %v227_v42 = vld [vmem:[%s3160_s3] sm:$0x3]  ;;  %s2652_s2 = smov 80   ;;  %s2653_s3 = smov 112   ;;  %v2659_v56 = vmov 0.0   ;;  %vm2660_vm7 = vmmov 0  }
  0x1a   :  { %v32_v26 = vadd.s32 128, %v31_v24  ;;  %288 = vmatpush1.bf16.msra.mxu1 %v2554_v30  ;;  %v231_v41 = vsub.s32 0, %v2789_v40  ;;  %v235_v43 = vsub.s32 1, %v2789_v40  ;;  %s2654_s29 = smov 48   ;;  %s2655_s30 = smov 96   ;;  %vm980_vm8 = vcmask 130048  }
  0x1b   :  { %289 = vmatprep.subr.bf16.mxu1 %v2555_v31  ;;  %s2656_s8 = smov 16   ;;  %s2657_s9 = smov 64   ;;  %v2661_v59 = vmov 1983009808   ;;  %v2662_v63 = vmov 1934713408  }
  0x1c   :  { %2374 = vmatpush3.bf16.msra.mxu0 %v2543_v20  ;;  %v232_v44 = vrot.slane %v227_v42, %v231_v41  ;;  %v236_v46 = vrot.slane %v227_v42, %v235_v43  ;;  %s2658_s10 = smov 32   ;;  %v407_v60 = vunpack.c.l.s4 %v2661_v59  ;;  %v469_v0 = vunpack.c.l.s4 %v2662_v63 }
  0x1d   :  { %2375 = vmatprep.subr.bf16.mxu0 %v2544_v21  ;;  %vm1349_vm9 = vcmask 64512   ;;  %vm1457_vm10 = vcmask 1043456   ;;  %vm2144_vm11 = vcmask 261120   ;;  %vm2147_vm12 = vcmask 392192  }
  0x1e   :  { %290 = vmatpush1.bf16.msra.mxu1 %v2557_v32  ;;  %v408_v2 = vunpack.c.0.s8 %v407_v60  ;;  %v470_v6 = vunpack.c.0.s8 %v469_v0 }
  0x1f   :  { %2415 = vmatprep.subr.bf16.mxu1 %v2659_v56 }
  0x20   :  { %2376 = vmatpush3.bf16.msra.mxu0 %v2545_v22  ;;  %v2815_v11 = vsub.s32 %v408_v2, %v2789_v40  ;;  %v2818_v23 = vsub.s32 %v470_v6, %v2789_v40 }
  0x21   :  { %2439 = vmatprep.subr.bf16.mxu0 %v2659_v56 }
  0x81   :  { %v35_v25 = vpop.permute.xlu0 %34 }
  0x82   :  { %vm39_vm0 = vcmp.eq.s32.totalorder %v31_v24, %v35_v25  ;;  %vm40_vm4 = vcmp.eq.s32.totalorder %v32_v26, %v35_v25 }
  0x85   :  { %v38_v27 = vpop.permute.xlu0 %37 }
  0x86   :  { %vm41_vm1 = vcmp.eq.s32.totalorder %v31_v24, %v38_v27  ;;  %vm42_vm2 = vcmp.eq.s32.totalorder %v32_v26, %v38_v27 }
  0x87   :  { %vm2309_vm3 = vmpackc.low %vm41_vm1, %vm39_vm0 }
  0x88   :  { %vm2307_vm5 = vmpackc.low %vm42_vm2, %vm40_vm4 }
  0x89   :  { %2308 = vmatprep.mubr.msk.bf16.mxu0 %vm2307_vm5, %v2651_v28 }
  0x8a   :  { %2310 = vmatmul.mubr.msk.bf16.vlgmr.msra.gmra.mrb[0].mxu0 %vm2309_vm3, %v2651_v28 }
  0x8b   :  { %2441 = vmatprep.mubr.msk.bf16.mxu0 %vm2660_vm7, %v2659_v56 }
 0x15d   :  { %v2377_v33 = vpop.f32.mrb[0].mxu0 }
 0x15e   :  { %v2378_v34 = vpop.f32.mrb[1].mxu0 }
 0x15f   :  { %v2379_v35 = vadd.f32 %v2378_v34, %v2377_v33  ;;  %v2380_v36 = vpop.f32.mrb[2].mxu0 }
 0x160   :  { %v2381_v37 = vpop.f32.mrb[3].mxu0 }
 0x161   :  { %v2382_v38 = vadd.f32 %v2381_v37, %v2380_v36 }
 0x163   :  { %v218_v39 = vpack.c.bf16 %v2382_v38, %v2379_v35 }
 0x165   :  { %2319 = vmatmul.mubr.msk.bf16.vlgmr.msra.gmra.mrb[0].mxu1 %vm279_vm6, %v218_v39 }
 0x166   :  { %2417 = vmatprep.mubr.msk.bf16.mxu1 %vm2660_vm7, %v2659_v56 }
 0x238   :  { %v317_v45 = vpop.f32.mrb[0].mxu1 }
 0x239   :  { %v319_v47 = vpop.f32.mrb[1].mxu1  ;;  %v318_v49 = vadd.f32 %v317_v45, %v232_v44 }
 0x23a   :  { %v321_v48 = vpop.f32.mrb[2].mxu1  ;;  %v320_v52 = vadd.f32 %v319_v47, %v236_v46 }
 0x23b   :  { %v322_v50 = vadd.f32 %v321_v48, %v232_v44  ;;  %v323_v51 = vpop.f32.mrb[3].mxu1 }
 0x23c   :  { %v324_v53 = vadd.f32 %v323_v51, %v236_v46 }
 0x23d   :  { %v326_v54 = vpack.c.bf16 %v322_v50, %v318_v49 }
 0x23e   :  { %v2800_v55 = vpack.c.bf16 %v324_v53, %v320_v52 }
 0x23f   :  { %333 = vrot.lane.b32.xlu0 %v326_v54, %s2652_s2  ;;  %329 = vrot.lane.b32.xlu1 %v326_v54, %s2653_s3  ;;  %v354_v12 = vshrl.u32 %v326_v54, 16 }
 0x243   :  { %337 = vrot.lane.b32.xlu0 %v326_v54, %s2654_s29  ;;  %331 = vrot.lane.b32.xlu1 %v326_v54, %s2655_s30 }
 0x247   :  { %341 = vrot.lane.b32.xlu0 %v326_v54, %s2656_s8  ;;  %335 = vrot.lane.b32.xlu1 %v326_v54, %s2657_s9 }
 0x24b   :  { %339 = vrot.lane.b32.xlu1 %v326_v54, %s2658_s10 }
 0x2b1   :  { %v334_v57 = vpop.permute.xlu0 %333  ;;  %v330_v58 = vpop.permute.xlu1 %329 }
 0x2b2   :  { %v352_v7 = vpack.i.b16 %v330_v58, %v326_v54  ;;  %v355_v8 = vshrl.u32 %v330_v58, 16  ;;  %v363_v15 = vshrl.u32 %v334_v57, 16 }
 0x2b4   :  { %v356_v24 = vpack.i.b16 %v355_v8, %v354_v12 }
 0x2b5   :  { %v332_v61 = vpop.permute.xlu1 %331  ;;  %v338_v62 = vpop.permute.xlu0 %337 }
 0x2b6   :  { %v371_v9 = vshrl.u32 %v338_v62, 16  ;;  %v362_v13 = vshrl.u32 %v332_v61, 16  ;;  %v360_v19 = vpack.i.b16 %v334_v57, %v332_v61 }
 0x2b8   :  { %v364_v25 = vpack.i.b16 %v363_v15, %v362_v13 }
 0x2b9   :  { %v336_v3 = vpop.permute.xlu1 %335  ;;  %v342_v10 = vpop.permute.xlu0 %341 }
 0x2ba   :  { %v368_v4 = vpack.i.b16 %v338_v62, %v336_v3  ;;  %v370_v5 = vshrl.u32 %v336_v3, 16  ;;  %v379_v20 = vshrl.u32 %v342_v10, 16 }
 0x2bc   :  { %v372_v16 = vpack.i.b16 %v371_v9, %v370_v5  ;;  %v404_v17 = vcombine.low %v352_v7, %v368_v4  ;;  %v405_v18 = vcombine.high %v352_v7, %v368_v4 }
 0x2bd   :  { %v340_v14 = vpop.permute.xlu1 %339 }
 0x2be   :  { %v376_v21 = vpack.i.b16 %v342_v10, %v340_v14  ;;  %v378_v22 = vshrl.u32 %v340_v14, 16  ;;  %v412_v29 = vrot.slane %v404_v17, %v2815_v11  ;;  %v419_v30 = vrot.slane %v405_v18, %v2815_v11 }
 0x2bf   :  { %v538_v31 = vcombine.low %v356_v24, %v372_v16  ;;  %v539_v32 = vcombine.high %v356_v24, %v372_v16 }
 0x2c0   :  { %v380_v26 = vpack.i.b16 %v379_v20, %v378_v22  ;;  %v420_v27 = vcombine.low %v360_v19, %v376_v21  ;;  %v421_v28 = vcombine.high %v360_v19, %v376_v21 }
 0x2c1   :  { %v546_v44 = vrot.slane %v538_v31, %v2815_v11  ;;  %v553_v45 = vrot.slane %v539_v32, %v2815_v11 }
 0x2c2   :  { %v428_v33 = vrot.slane %v420_v27, %v2815_v11  ;;  %v435_v34 = vrot.slane %v421_v28, %v2815_v11  ;;  %v554_v35 = vcombine.low %v364_v25, %v380_v26  ;;  %v555_v36 = vcombine.high %v364_v25, %v380_v26 }
 0x2c4   :  { %v466_v37 = vcombine.low %v412_v29, %v428_v33  ;;  %v467_v38 = vcombine.high %v412_v29, %v428_v33  ;;  %v482_v39 = vcombine.low %v419_v30, %v435_v34  ;;  %v483_v42 = vcombine.high %v419_v30, %v435_v34 }
 0x2c5   :  { %v562_v46 = vrot.slane %v554_v35, %v2815_v11  ;;  %v569_v47 = vrot.slane %v555_v36, %v2815_v11 }
 0x2c6   :  { %v474_v48 = vrot.slane %v466_v37, %v2818_v23  ;;  %v481_v49 = vrot.slane %v467_v38, %v2818_v23  ;;  %v490_v50 = vrot.slane %v482_v39, %v2818_v23  ;;  %v497_v51 = vrot.slane %v483_v42, %v2818_v23 }
 0x2c7   :  { %v600_v52 = vcombine.low %v546_v44, %v562_v46  ;;  %v601_v53 = vcombine.high %v546_v44, %v562_v46  ;;  %v616_v54 = vcombine.low %v553_v45, %v569_v47  ;;  %v617_v57 = vcombine.high %v553_v45, %v569_v47 }
 0x2c8   :  { %v2320_v58 = vcombine.low %v474_v48, %v481_v49  ;;  %v2322_v59 = vcombine.high %v474_v48, %v481_v49  ;;  %v2328_v60 = vcombine.low %v490_v50, %v497_v51  ;;  %v2330_v61 = vcombine.high %v490_v50, %v497_v51 }
 0x2c9   :  { %v608_v62 = vrot.slane %v600_v52, %v2818_v23  ;;  %v615_v63 = vrot.slane %v601_v53, %v2818_v23  ;;  %v624_v0 = vrot.slane %v616_v54, %v2818_v23  ;;  %v631_v2 = vrot.slane %v617_v57, %v2818_v23 }
 0x2ca   :  { %v680_v3 = vrot.slane %v2320_v58, %v2815_v11  ;;  %v696_v4 = vrot.slane %v2322_v59, %v2815_v11  ;;  %v798_v5 = vrot.slane %v2328_v60, %v2815_v11  ;;  %v814_v6 = vrot.slane %v2330_v61, %v2815_v11 }
 0x2cb   :  { %v2324_v7 = vcombine.low %v608_v62, %v615_v63  ;;  %v2326_v8 = vcombine.high %v608_v62, %v615_v63  ;;  %v2332_v9 = vcombine.low %v624_v0, %v631_v2  ;;  %v2334_v10 = vcombine.high %v624_v0, %v631_v2 }
 0x2cc   :  { %v705_v12 = vcombine.high %v680_v3, %v696_v4  ;;  %v823_v13 = vcombine.high %v798_v5, %v814_v6  ;;  %v704_v29 = vcombine.low %v680_v3, %v696_v4  ;;  %v822_v30 = vcombine.low %v798_v5, %v814_v6 }
 0x2cd   :  { %v739_v14 = vrot.slane %v2324_v7, %v2815_v11  ;;  %v755_v15 = vrot.slane %v2326_v8, %v2815_v11  ;;  %v857_v16 = vrot.slane %v2332_v9, %v2815_v11  ;;  %v873_v17 = vrot.slane %v2334_v10, %v2815_v11 }
 0x2ce   :  { %v719_v20 = vrot.slane %v705_v12, %v2818_v23  ;;  %v2847_v22 = vrot.slane %v823_v13, %v2818_v23  ;;  %v712_v39 = vrot.slane %v704_v29, %v2818_v23  ;;  %v830_v42 = vrot.slane %v822_v30, %v2818_v23 }
 0x2cf   :  { %v764_v18 = vcombine.high %v739_v14, %v755_v15  ;;  %v882_v19 = vcombine.high %v857_v16, %v873_v17  ;;  %v763_v25 = vcombine.low %v739_v14, %v755_v15  ;;  %v881_v27 = vcombine.low %v857_v16, %v873_v17 }
 0x2d0   :  { %v923_v37 = vshrl.u32 %v719_v20, 16  ;;  %v847_v38 = vcombine.high %v2847_v22, %v2650_v1  ;;  %v729_v53 = vcombine.high %v719_v20, %v2650_v1  ;;  %v911_v54 = vshrl.u32 %v712_v39, 16 }
 0x2d1   :  { %v778_v21 = vrot.slane %v764_v18, %v2818_v23  ;;  %v2850_v24 = vrot.slane %v882_v19, %v2818_v23  ;;  %v771_v35 = vrot.slane %v763_v25, %v2818_v23  ;;  %v2863_v36 = vrot.slane %v881_v27, %v2818_v23 }
 0x2d2   :  { %v846_v57 = vcombine.high %v830_v42, %v2650_v1  ;;  %v929_v0 = vshrl.u32 %v729_v53, 16  ;;  %v728_v2 = vcombine.high %v712_v39, %v2650_v1  ;;  %v959_v8 = vshrl.u32 %v2847_v22, 16 }
 0x2d3   :  { %v922_v26 = vpack.i.b16 %v778_v21, %v719_v20  ;;  %v958_v28 = vpack.i.b16 %v2850_v24, %v2847_v22  ;;  %v924_v33 = vshrl.u32 %v778_v21, 16  ;;  %v2858_v34 = vcombine.high %v2850_v24, %v2650_v1 }
 0x2d4   :  { %v910_v46 = vpack.i.b16 %v771_v35, %v712_v39  ;;  %v946_v47 = vpack.i.b16 %v2863_v36, %v830_v42  ;;  %v788_v50 = vcombine.high %v778_v21, %v2650_v1  ;;  %v912_v51 = vshrl.u32 %v771_v35, 16 }
 0x2d5   :  { %v985_v31 = vsel %vm980_vm8, %v922_v26, 0  ;;  %v1169_v32 = vsel %vm980_vm8, %v958_v28, 0  ;;  %v925_v44 = vpack.i.b16 %v924_v33, %v923_v37  ;;  %v964_v45 = vpack.i.b16 %v2858_v34, %v847_v38 }
 0x2d6   :  { %2416 = vmatpush3.bf16.xpose.msra.mxu1 %v985_v31  ;;  %2440 = vmatpush3.bf16.xpose.msra.mxu0 %v1169_v32  ;;  %v905_v52 = vcombine.high %v2863_v36, %v2650_v1  ;;  %v928_v58 = vpack.i.b16 %v788_v50, %v729_v53  ;;  %v913_v59 = vpack.i.b16 %v912_v51, %v911_v54  ;;  %v930_v62 = vshrl.u32 %v788_v50, 16 }
 0x2d7   :  { %2421 = vmatprep.subr.bf16.mxu1 %v2659_v56  ;;  %2451 = vmatprep.subr.bf16.mxu0 %v2659_v56  ;;  %v1031_v48 = vsel %vm980_vm8, %v925_v44, 0  ;;  %v1261_v49 = vsel %vm980_vm8, %v964_v45, 0  ;;  %v787_v63 = vcombine.high %v771_v35, %v2650_v1  ;;  %v960_v6 = vshrl.u32 %v2850_v24, 16 }
 0x2d8   :  { %v952_v60 = vpack.i.b16 %v905_v52, %v846_v57  ;;  %v1077_v61 = vsel %vm980_vm8, %v928_v58, 0  ;;  %v931_v3 = vpack.i.b16 %v930_v62, %v929_v0  ;;  %v917_v9 = vshrl.u32 %v728_v2, 16 }
 0x2d9   :  { %v916_v4 = vpack.i.b16 %v787_v63, %v728_v2  ;;  %v918_v7 = vshrl.u32 %v787_v63, 16  ;;  %v961_v10 = vpack.i.b16 %v960_v6, %v959_v8  ;;  %v966_v14 = vshrl.u32 %v2858_v34, 16 }
 0x2da   :  { %v1123_v5 = vsel %vm980_vm8, %v931_v3, 0  ;;  %v948_v15 = vshrl.u32 %v2863_v36, 16  ;;  %v965_v16 = vshrl.u32 %v847_v38, 16  ;;  %v947_v17 = vshrl.u32 %v830_v42, 16 }
 0x2db   :  { %v919_v12 = vpack.i.b16 %v918_v7, %v917_v9  ;;  %v1215_v13 = vsel %vm980_vm8, %v961_v10, 0  ;;  %v954_v21 = vshrl.u32 %v905_v52, 16  ;;  %v953_v22 = vshrl.u32 %v846_v57, 16 }
 0x2dc   :  { %v967_v18 = vpack.i.b16 %v966_v14, %v965_v16  ;;  %v949_v19 = vpack.i.b16 %v948_v15, %v947_v17 }
 0x2dd   :  { %2418 = vmatmul.mubr.msk.bf16.vlgmr.msra.gmra.mrb[4].mxu1 %vm980_vm8, %v910_v46  ;;  %2442 = vmatmul.mubr.msk.bf16.vlgmr.msra.gmra.mrb[4].mxu0 %vm980_vm8, %v946_v47  ;;  %v955_v24 = vpack.i.b16 %v954_v21, %v953_v22 }
 0x2de   :  { %2422 = vmatpush3.bf16.xpose.msra.mxu1 %v1031_v48  ;;  %2452 = vmatpush3.bf16.xpose.msra.mxu0 %v1261_v49  ;;  %v1307_v20 = vsel %vm980_vm8, %v967_v18, 0 }
 0x2df   :  { %2423 = vmatprep.mubr.msk.bf16.mxu1 %vm2660_vm7, %v2659_v56  ;;  %2453 = vmatprep.mubr.msk.bf16.mxu0 %vm2660_vm7, %v2659_v56 }
 0x2e0   :  { %2427 = vmatprep.subr.bf16.mxu1 %v2659_v56  ;;  %2463 = vmatprep.subr.bf16.mxu0 %v2659_v56 }
 0x2e5   :  { %2424 = vmatmul.mubr.msk.bf16.vlgmr.msra.gmra.mrb[8].mxu1 %vm980_vm8, %v913_v59  ;;  %2454 = vmatmul.mubr.msk.bf16.vlgmr.msra.gmra.mrb[8].mxu0 %vm980_vm8, %v952_v60 }
 0x2e6   :  { %2428 = vmatpush3.bf16.xpose.msra.mxu1 %v1077_v61  ;;  %2429 = vmatprep.mubr.msk.bf16.mxu1 %vm2660_vm7, %v2659_v56 }
 0x2e7   :  { %2433 = vmatprep.subr.bf16.mxu1 %v2659_v56  ;;  %2465 = vmatprep.mubr.msk.bf16.mxu0 %vm2660_vm7, %v2659_v56 }
 0x2ed   :  { %2430 = vmatmul.mubr.msk.bf16.vlgmr.msra.gmra.mrb[12].mxu1 %vm980_vm8, %v916_v4 }
 0x2ee   :  { %2434 = vmatpush3.bf16.xpose.msra.mxu1 %v1123_v5  ;;  %2435 = vmatprep.mubr.msk.bf16.mxu1 %vm2660_vm7, %v2659_v56 }
 0x2ef   :  { %2445 = vmatprep.subr.bf16.mxu1 %v2659_v56 }
 0x2f5   :  { %2436 = vmatmul.mubr.msk.bf16.vlgmr.msra.gmra.mrb[16].mxu1 %vm980_vm8, %v919_v12 }
 0x2f6   :  { %2446 = vmatpush3.bf16.xpose.msra.mxu1 %v1215_v13  ;;  %2447 = vmatprep.mubr.msk.bf16.mxu1 %vm2660_vm7, %v2659_v56 }
 0x2f7   :  { %2457 = vmatprep.subr.bf16.mxu1 %v2659_v56 }
 0x2fd   :  { %2448 = vmatmul.mubr.msk.bf16.vlgmr.msra.gmra.mrb[20].mxu1 %vm980_vm8, %v949_v19 }
 0x2fe   :  { %2458 = vmatpush3.bf16.xpose.msra.mxu1 %v1307_v20  ;;  %2459 = vmatprep.mubr.msk.bf16.mxu1 %vm2660_vm7, %v2659_v56 }
 0x2ff   :  { %2469 = vmatprep.subr.bf16.mxu1 %v2659_v56 }
 0x305   :  { %2460 = vmatmul.mubr.msk.bf16.vlgmr.msra.gmra.mrb[24].mxu1 %vm980_vm8, %v955_v24 }
 0x306   :  { %2471 = vmatprep.mubr.msk.bf16.mxu1 %vm2660_vm7, %v2659_v56 }
 0x3b0   :  { %v1021_v25 = vpop.f32.mrb[4].mxu1  ;;  %v2919_v26 = vpop.f32.mrb[4].mxu0 }
 0x3b1   :  { %v2419_v27 = vpop.f32.mrb[5].mxu1  ;;  %v2443_v28 = vpop.f32.mrb[5].mxu0  ;;  %v1350_v29 = vsel %vm1349_vm9, %v1021_v25, -inf  ;;  %v1362_v51 = vsel %vm1349_vm9, %v2919_v26, -inf }
 0x3b2   :  { %v1208_v30 = vpop.f32.mrb[6].mxu0  ;;  %1351 = vmax.xlane.f32.xlu1 %v1350_v29  ;;  %v1024_v31 = vpop.f32.mrb[6].mxu1 }
 0x3b3   :  { %v2420_v32 = vpop.f32.mrb[7].mxu1  ;;  %v2444_v33 = vpop.f32.mrb[7].mxu0 }
 0x3b8   :  { %v1067_v34 = vpop.f32.mrb[8].mxu1  ;;  %v2922_v35 = vpop.f32.mrb[8].mxu0 }
 0x3b9   :  { %v2425_v36 = vpop.f32.mrb[9].mxu1  ;;  %v2455_v37 = vpop.f32.mrb[9].mxu0  ;;  %v1353_v38 = vsel %vm1349_vm9, %v1067_v34, -inf  ;;  %v1368_v54 = vsel %vm1349_vm9, %v2922_v35, -inf }
 0x3ba   :  { %v1300_v39 = vpop.f32.mrb[10].mxu0  ;;  %1354 = vmax.xlane.f32.xlu0 %v1353_v38  ;;  %v1070_v42 = vpop.f32.mrb[10].mxu1 }
 0x3bb   :  { %v2426_v44 = vpop.f32.mrb[11].mxu1  ;;  %v2456_v45 = vpop.f32.mrb[11].mxu0 }
 0x3c0   :  { %v1113_v46 = vpop.f32.mrb[12].mxu1 }
 0x3c1   :  { %v2431_v47 = vpop.f32.mrb[13].mxu1  ;;  %v1356_v48 = vsel %vm1349_vm9, %v1113_v46, -inf }
 0x3c2   :  { %1357 = vmax.xlane.f32.xlu0 %v1356_v48  ;;  %v1116_v49 = vpop.f32.mrb[14].mxu1 }
 0x3c3   :  { %v2432_v50 = vpop.f32.mrb[15].mxu1 }
 0x3c6   :  { %1363 = vmax.xlane.f32.xlu0 %v1362_v51 }
 0x3c8   :  { %v1159_v52 = vpop.f32.mrb[16].mxu1 }
 0x3c9   :  { %v2437_v53 = vpop.f32.mrb[17].mxu1  ;;  %v1359_v57 = vsel %vm1349_vm9, %v1159_v52, -inf }
 0x3ca   :  { %1369 = vmax.xlane.f32.xlu0 %v1368_v54  ;;  %1360 = vmax.xlane.f32.xlu1 %v1359_v57  ;;  %v1162_v58 = vpop.f32.mrb[18].mxu1 }
 0x3cb   :  { %v2438_v59 = vpop.f32.mrb[19].mxu1 }
 0x3d0   :  { %v1251_v60 = vpop.f32.mrb[20].mxu1 }
 0x3d1   :  { %v2449_v61 = vpop.f32.mrb[21].mxu1  ;;  %v1365_v62 = vsel %vm1349_vm9, %v1251_v60, -inf }
 0x3d2   :  { %1366 = vmax.xlane.f32.xlu1 %v1365_v62  ;;  %v1254_v63 = vpop.f32.mrb[22].mxu1  ;;  %v386_v62 = vshrl.u32 %v2800_v55, 16 }
 0x3d3   :  { %v2450_v0 = vpop.f32.mrb[23].mxu1 }
 0x3d8   :  { %v1343_v2 = vpop.f32.mrb[24].mxu1 }
 0x3d9   :  { %v2461_v3 = vpop.f32.mrb[25].mxu1  ;;  %v1371_v4 = vsel %vm1349_vm9, %v1343_v2, -inf }
 0x3da   :  { %1372 = vmax.xlane.f32.xlu1 %v1371_v4  ;;  %v1346_v5 = vpop.f32.mrb[26].mxu1 }
 0x3db   :  { %v2462_v6 = vpop.f32.mrb[27].mxu1 }
 0x3eb   :  { %346 = vrot.lane.b32.xlu1 %v2800_v55, %s2655_s30 }
 0x43f   :  { %v1352_v7 = vpop.xlane.xlu1 %1351 }
 0x440   :  { %v1374_v8 = vsub.f32 %v1021_v25, %v1352_v7 }
 0x442   :  { %v1382_v9 = vmul.f32 1.442695, %v1374_v8 }
 0x444   :  { %2570 = vpow2.f32 %v1382_v9 }
 0x447   :  { %v1355_v10 = vpop.xlane.xlu0 %1354 }
 0x448   :  { %v1375_v12 = vsub.f32 %v1067_v34, %v1355_v10 }
 0x44a   :  { %v1384_v13 = vmul.f32 1.442695, %v1375_v12 }
 0x44c   :  { %2572 = vpow2.f32 %v1384_v13 }
 0x44e   :  { %v2571_v14 = vpop.eup %2570 }
 0x44f   :  { %v1398_v15 = vsel %vm1349_vm9, %v2571_v14, 0.0  ;;  %v1358_v18 = vpop.xlane.xlu0 %1357 }
 0x450   :  { %1399 = vadd.xlane.f32.xlu0 %v1398_v15  ;;  %v1376_v19 = vsub.f32 %v1113_v46, %v1358_v18 }
 0x452   :  { %v1386_v22 = vmul.f32 1.442695, %v1376_v19 }
 0x453   :  { %v1364_v20 = vpop.xlane.xlu0 %1363 }
 0x454   :  { %v1378_v24 = vsub.f32 %v2919_v26, %v1364_v20  ;;  %2574 = vpow2.f32 %v1386_v22 }
 0x456   :  { %v2936_v16 = vpop.eup %2572  ;;  %v1390_v28 = vmul.f32 1.442695, %v1378_v24 }
 0x457   :  { %v1401_v17 = vsel %vm1349_vm9, %v2936_v16, 0.0  ;;  %v1361_v21 = vpop.xlane.xlu1 %1360  ;;  %v1370_v29 = vpop.xlane.xlu0 %1369 }
 0x458   :  { %1402 = vadd.xlane.f32.xlu1 %v1401_v17  ;;  %v1377_v27 = vsub.f32 %v1159_v52, %v1361_v21  ;;  %v1380_v32 = vsub.f32 %v2922_v35, %v1370_v29  ;;  %2576 = vpow2.f32 %v1390_v28 }
 0x45a   :  { %v1388_v33 = vmul.f32 1.442695, %v1377_v27  ;;  %v1394_v37 = vmul.f32 1.442695, %v1380_v32 }
 0x45c   :  { %2578 = vpow2.f32 %v1388_v33 }
 0x45e   :  { %v2946_v39 = vpop.eup %2574 }
 0x45f   :  { %v1367_v25 = vpop.xlane.xlu1 %1366  ;;  %v1404_v26 = vsel %vm1349_vm9, %v2946_v39, 0.0 }
 0x460   :  { %v1379_v30 = vsub.f32 %v1251_v60, %v1367_v25 }
 0x462   :  { %v1392_v34 = vmul.f32 1.442695, %v1379_v30  ;;  %v2950_v42 = vpop.eup %2576 }
 0x463   :  { %v1410_v35 = vsel %vm1349_vm9, %v2950_v42, 0.0 }
 0x464   :  { %2580 = vpow2.f32 %v1392_v34 }
 0x465   :  { %2582 = vpow2.f32 %v1394_v37 }
 0x466   :  { %344 = vrot.lane.b32.xlu0 %v2800_v55, %s2653_s3  ;;  %v2952_v44 = vpop.eup %2578 }
 0x467   :  { %v1373_v31 = vpop.xlane.xlu1 %1372  ;;  %v1407_v48 = vsel %vm1349_vm9, %v2952_v44, 0.0 }
 0x468   :  { %v1381_v36 = vsub.f32 %v1343_v2, %v1373_v31 }
 0x469   :  { %348 = vrot.lane.b32.xlu1 %v2800_v55, %s2652_s2 }
 0x46a   :  { %v1396_v38 = vmul.f32 1.442695, %v1381_v36  ;;  %v399_v36 = vpack.i.b16 %v2650_v1, %v2650_v1 }
 0x46b   :  { %v347_v53 = vpop.permute.xlu1 %346 }
 0x46c   :  { %2584 = vpow2.f32 %v1396_v38  ;;  %v394_v0 = vshrl.u32 %v347_v53, 16 }
 0x46e   :  { %v2956_v45 = vpop.eup %2580 }
 0x46f   :  { %v2958_v46 = vpop.eup %2582  ;;  %v1413_v47 = vsel %vm1349_vm9, %v2956_v45, 0.0 }
 0x470   :  { %v1416_v50 = vsel %vm1349_vm9, %v2958_v46, 0.0 }
 0x476   :  { %v2964_v49 = vpop.eup %2584 }
 0x477   :  { %v1419_v51 = vsel %vm1349_vm9, %v2964_v49, 0.0 }
 0x485   :  { %1405 = vadd.xlane.f32.xlu0 %v1404_v26 }
 0x489   :  { %1411 = vadd.xlane.f32.xlu0 %v1410_v35 }
 0x48d   :  { %1414 = vadd.xlane.f32.xlu0 %v1413_v47  ;;  %1408 = vadd.xlane.f32.xlu1 %v1407_v48 }
 0x491   :  { %1417 = vadd.xlane.f32.xlu1 %v1416_v50  ;;  %1420 = vadd.xlane.f32.xlu0 %v1419_v51 }
 0x4dd   :  { %v1400_v52 = vpop.xlane.xlu0 %1399 }
 0x4de   :  { %2586 = vrcp.f32 %v1400_v52 }
 0x4e1   :  { %v345_v54 = vpop.permute.xlu0 %344 }
 0x4e2   :  { %v387_v58 = vshrl.u32 %v345_v54, 16  ;;  %v2971_v60 = vpack.i.b16 %v345_v54, %v2800_v55 }
 0x4e4   :  { %v388_v4 = vpack.i.b16 %v387_v58, %v386_v62  ;;  %v443_v5 = vrot.slane %v2971_v60, %v2815_v11 }
 0x4e5   :  { %v1403_v57 = vpop.xlane.xlu1 %1402 }
 0x4e6   :  { %2588 = vrcp.f32 %v1403_v57  ;;  %v577_v10 = vrot.slane %v388_v4, %v2815_v11  ;;  %v570_v54 = vcombine.high %v388_v4, %v399_v36 }
 0x4e8   :  { %v2587_v59 = vpop.eup %2586 }
 0x4e9   :  { %v1430_v61 = vmul.f32 %v2587_v59, %v2571_v14  ;;  %v349_v63 = vpop.permute.xlu1 %348 }
 0x4ea   :  { %v392_v2 = vpack.i.b16 %v349_v63, %v347_v53  ;;  %v395_v3 = vshrl.u32 %v349_v63, 16  ;;  %v436_v63 = vcombine.high %v2971_v60, %v399_v36 }
 0x4eb   :  { %1438 = vst.msk [vmem:[#allocation4] sm:$0xff] %vm1349_vm9, %v1430_v61  ;;  %v1446_v59 = vpack.c.bf16 %v1430_v61, %v1430_v61 }
 0x4ec   :  { %v396_v6 = vpack.i.b16 %v395_v3, %v394_v0  ;;  %v458_v7 = vrot.slane %v392_v2, %v2815_v11  ;;  %v451_v57 = vcombine.high %v392_v2, %v399_v36  ;;  %v584_v2 = vrot.slane %v570_v54, %v2815_v11 }
 0x4ed   :  { %v450_v61 = vrot.slane %v436_v63, %v2815_v11 }
 0x4ee   :  { %v498_v8 = vcombine.low %v443_v5, %v458_v7  ;;  %v499_v9 = vcombine.high %v443_v5, %v458_v7  ;;  %v592_v12 = vrot.slane %v396_v6, %v2815_v11  ;;  %v585_v47 = vcombine.high %v396_v6, %v399_v36 }
 0x4ef   :  { %v465_v4 = vrot.slane %v451_v57, %v2815_v11 }
 0x4f0   :  { %v2589_v55 = vpop.eup %2588  ;;  %v506_v13 = vrot.slane %v498_v8, %v2818_v23  ;;  %v513_v14 = vrot.slane %v499_v9, %v2818_v23  ;;  %v632_v17 = vcombine.low %v577_v10, %v592_v12  ;;  %v633_v18 = vcombine.high %v577_v10, %v592_v12 }
 0x4f1   :  { %v1431_v15 = vmul.f32 %v2589_v55, %v2936_v16  ;;  %v599_v0 = vrot.slane %v585_v47, %v2815_v11  ;;  %v514_v8 = vcombine.low %v450_v61, %v465_v4  ;;  %v515_v9 = vcombine.high %v450_v61, %v465_v4 }
 0x4f2   :  { %v2321_v19 = vcombine.low %v506_v13, %v513_v14  ;;  %v2323_v20 = vcombine.high %v506_v13, %v513_v14  ;;  %v640_v21 = vrot.slane %v632_v17, %v2818_v23  ;;  %v647_v22 = vrot.slane %v633_v18, %v2818_v23 }
 0x4f3   :  { %1439 = vst.msk [vmem:[#allocation4 + $0x8] sm:$0xff] %vm1349_vm9, %v1431_v15  ;;  %v1447_v5 = vpack.c.bf16 %v1431_v15, %v1431_v15  ;;  %v648_v6 = vcombine.low %v584_v2, %v599_v0  ;;  %v649_v7 = vcombine.high %v584_v2, %v599_v0  ;;  %v522_v55 = vrot.slane %v514_v8, %v2818_v23  ;;  %v2560_v8 = vld [vmem:[%s3161_s4 + $0x4] ss:$8 sps:$4 sm:$0xff]  }
 0x4f4   :  { %v687_v24 = vrot.slane %v2321_v19, %v2815_v11  ;;  %v703_v25 = vrot.slane %v2323_v20, %v2815_v11  ;;  %v2325_v27 = vcombine.low %v640_v21, %v647_v22  ;;  %v2327_v28 = vcombine.high %v640_v21, %v647_v22 }
 0x4f5   :  { %v656_v10 = vrot.slane %v648_v6, %v2818_v23  ;;  %v663_v12 = vrot.slane %v649_v7, %v2818_v23  ;;  %v529_v13 = vrot.slane %v515_v9, %v2818_v23  ;;  %v2558_v7 = vld [vmem:[%s3161_s4] ss:$8 sps:$4 sm:$0xff]   ;;  %v2563_v9 = vld [vmem:[%s3161_s4 + $0x14] ss:$8 sps:$4 sm:$0xff]  }
 0x4f6   :  { %v720_v29 = vcombine.low %v687_v24, %v703_v25  ;;  %v746_v30 = vrot.slane %v2325_v27, %v2815_v11  ;;  %v762_v16 = vrot.slane %v2327_v28, %v2815_v11 }
 0x4f7   :  { %v2333_v14 = vcombine.low %v656_v10, %v663_v12  ;;  %v2335_v15 = vcombine.high %v656_v10, %v663_v12  ;;  %v2329_v17 = vcombine.low %v522_v55, %v529_v13  ;;  %v2331_v18 = vcombine.high %v522_v55, %v529_v13  ;;  %v2566_v10 = vld [vmem:[%s3161_s4 + $0x24] ss:$8 sps:$4 sm:$0xff]   ;;  %v2564_v12 = vld [vmem:[%s3161_s4 + $0x20] ss:$8 sps:$4 sm:$0xff]  }
 0x4f8   :  { %v727_v31 = vrot.slane %v720_v29, %v2818_v23  ;;  %v779_v32 = vcombine.low %v746_v30, %v762_v16 }
 0x4f9   :  { %v864_v20 = vrot.slane %v2333_v14, %v2815_v11  ;;  %v880_v21 = vrot.slane %v2335_v15, %v2815_v11  ;;  %v805_v22 = vrot.slane %v2329_v17, %v2815_v11  ;;  %v821_v24 = vrot.slane %v2331_v18, %v2815_v11 }
 0x4fa   :  { %v730_v33 = vcombine.high %v727_v31, %v2650_v1  ;;  %v786_v34 = vrot.slane %v779_v32, %v2818_v23  ;;  %v935_v38 = vshrl.u32 %v727_v31, 16 }
 0x4fb   :  { %v897_v27 = vcombine.low %v864_v20, %v880_v21  ;;  %v838_v28 = vcombine.low %v805_v22, %v821_v24 }
 0x4fc   :  { %v934_v37 = vpack.i.b16 %v786_v34, %v727_v31  ;;  %v936_v26 = vshrl.u32 %v786_v34, 16  ;;  %v789_v35 = vcombine.high %v786_v34, %v2650_v1  ;;  %v941_v48 = vshrl.u32 %v730_v33, 16 }
 0x4fd   :  { %v904_v16 = vrot.slane %v897_v27, %v2818_v23  ;;  %v845_v31 = vrot.slane %v838_v28, %v2818_v23 }
 0x4fe   :  { %v1459_v50 = vsel %vm1457_vm10, %v934_v37, 0  ;;  %v937_v51 = vpack.i.b16 %v936_v26, %v935_v38  ;;  %v940_v52 = vpack.i.b16 %v789_v35, %v730_v33  ;;  %v942_v53 = vshrl.u32 %v789_v35, 16 }
 0x4ff   :  { %2464 = vmatpush3.bf16.msra.mxu0 %v1459_v50  ;;  %v970_v37 = vpack.i.b16 %v904_v16, %v845_v31  ;;  %v848_v50 = vcombine.high %v845_v31, %v2650_v1 }
 0x500   :  { %v1505_v58 = vsel %vm1457_vm10, %v937_v51, 0  ;;  %2475 = vmatprep.subr.bf16.mxu0 %v2659_v56  ;;  %v943_v62 = vpack.i.b16 %v942_v53, %v941_v48  ;;  %v1551_v3 = vsel %vm1457_vm10, %v940_v52, 0  ;;  %v907_v48 = vcombine.high %v904_v16, %v2650_v1 }
 0x501   :  { %2470 = vmatpush3.bf16.msra.mxu1 %v1505_v58  ;;  %v1643_v47 = vsel %vm1457_vm10, %v970_v37, 0  ;;  %v971_v52 = vshrl.u32 %v845_v31, 16 }
 0x502   :  { %2466 = vmatmul.mubr.msk.bf16.vlgmr.msra.gmra.mrb[12].mxu0 %vm1349_vm9, %v1446_v59  ;;  %2481 = vmatprep.subr.bf16.mxu1 %v2659_v56  ;;  %v1597_v60 = vsel %vm1457_vm10, %v943_v62, 0  ;;  %v976_v54 = vpack.i.b16 %v907_v48, %v848_v50  ;;  %v978_v2 = vshrl.u32 %v907_v48, 16 }
 0x503   :  { %2476 = vmatpush3.bf16.msra.mxu0 %v1551_v3  ;;  %2477 = vmatprep.mubr.msk.bf16.mxu0 %vm2660_vm7, %v2659_v56 }
 0x504   :  { %2472 = vmatmul.mubr.msk.bf16.vlgmr.msra.gmra.mrb[28].mxu1 %vm1349_vm9, %v1447_v5  ;;  %2487 = vmatprep.subr.bf16.mxu0 %v2659_v56  ;;  %v1735_v5 = vsel %vm1457_vm10, %v976_v54, 0 }
 0x505   :  { %2482 = vmatpush3.bf16.msra.mxu1 %v1597_v60  ;;  %2483 = vmatprep.mubr.msk.bf16.mxu1 %vm2660_vm7, %v2659_v56 }
 0x506   :  { %2493 = vmatprep.subr.bf16.mxu1 %v2659_v56 }
 0x512   :  { %v1406_v19 = vpop.xlane.xlu0 %1405 }
 0x513   :  { %2590 = vrcp.f32 %v1406_v19 }
 0x516   :  { %v1412_v25 = vpop.xlane.xlu0 %1411 }
 0x517   :  { %2592 = vrcp.f32 %v1412_v25 }
 0x51a   :  { %v1415_v29 = vpop.xlane.xlu0 %1414  ;;  %v1409_v30 = vpop.xlane.xlu1 %1408 }
 0x51b   :  { %2594 = vrcp.f32 %v1415_v29 }
 0x51c   :  { %2596 = vrcp.f32 %v1409_v30 }
 0x51d   :  { %v2591_v32 = vpop.eup %2590 }
 0x51e   :  { %v1432_v33 = vmul.f32 %v2591_v32, %v2946_v39  ;;  %v1421_v34 = vpop.xlane.xlu0 %1420  ;;  %v1418_v36 = vpop.xlane.xlu1 %1417  ;;  %v972_v39 = vshrl.u32 %v904_v16, 16 }
 0x51f   :  { %2598 = vrcp.f32 %v1421_v34 }
 0x520   :  { %1440 = vst.msk [vmem:[#allocation4 + $0x10] sm:$0xff] %vm1349_vm9, %v1432_v33  ;;  %2600 = vrcp.f32 %v1418_v36  ;;  %v1448_v38 = vpack.c.bf16 %v1432_v33, %v1432_v33  ;;  %v973_v58 = vpack.i.b16 %v972_v39, %v971_v52 }
 0x521   :  { %v2593_v26 = vpop.eup %2592 }
 0x522   :  { %v1434_v35 = vmul.f32 %v2593_v26, %v2950_v42  ;;  %2478 = vmatmul.mubr.msk.bf16.vlgmr.msra.gmra.mrb[16].mxu0 %vm1349_vm9, %v1448_v38 }
 0x523   :  { %2488 = vmatpush3.bf16.msra.mxu0 %v1643_v47  ;;  %2489 = vmatprep.mubr.msk.bf16.mxu0 %vm2660_vm7, %v2659_v56 }
 0x524   :  { %1442 = vst.msk [vmem:[#allocation4 + $0x20] sm:$0xff] %vm1349_vm9, %v1434_v35  ;;  %2499 = vmatprep.subr.bf16.mxu0 %v2659_v56  ;;  %v1450_v59 = vpack.c.bf16 %v1434_v35, %v1434_v35 }
 0x525   :  { %v2595_v51 = vpop.eup %2594 }
 0x526   :  { %v2597_v42 = vpop.eup %2596  ;;  %v1435_v53 = vmul.f32 %v2595_v51, %v2956_v45 }
 0x527   :  { %v1433_v57 = vmul.f32 %v2597_v42, %v2952_v44  ;;  %v1689_v44 = vsel %vm1457_vm10, %v973_v58, 0 }
 0x528   :  { %1443 = vst.msk [vmem:[#allocation4 + $0x28] sm:$0xff] %vm1349_vm9, %v1435_v53  ;;  %v1451_v60 = vpack.c.bf16 %v1435_v53, %v1435_v53 }
 0x529   :  { %v2599_v62 = vpop.eup %2598  ;;  %1441 = vst.msk [vmem:[#allocation4 + $0x18] sm:$0xff] %vm1349_vm9, %v1433_v57  ;;  %v1449_v63 = vpack.c.bf16 %v1433_v57, %v1433_v57 }
 0x52a   :  { %v2601_v0 = vpop.eup %2600  ;;  %v1437_v3 = vmul.f32 %v2599_v62, %v2964_v49  ;;  %2490 = vmatmul.mubr.msk.bf16.vlgmr.msra.gmra.mrb[20].mxu0 %vm1349_vm9, %v1450_v59 }
 0x52b   :  { %v1436_v45 = vmul.f32 %v2601_v0, %v2958_v46  ;;  %2484 = vmatmul.mubr.msk.bf16.vlgmr.msra.gmra.mrb[32].mxu1 %vm1349_vm9, %v1449_v63  ;;  %2500 = vmatpush3.bf16.msra.mxu0 %v1735_v5  ;;  %v977_v46 = vshrl.u32 %v848_v50, 16 }
 0x52c   :  { %1445 = vst.msk [vmem:[#allocation4 + $0x38] sm:$0xff] %vm1349_vm9, %v1437_v3  ;;  %2494 = vmatpush3.bf16.msra.mxu1 %v1689_v44  ;;  %2495 = vmatprep.mubr.msk.bf16.mxu1 %vm2660_vm7, %v2659_v56  ;;  %v1453_v6 = vpack.c.bf16 %v1437_v3, %v1437_v3 }
 0x52d   :  { %1444 = vst.msk [vmem:[#allocation4 + $0x30] sm:$0xff] %vm1349_vm9, %v1436_v45  ;;  %2501 = vmatprep.mubr.msk.bf16.mxu0 %vm2660_vm7, %v2659_v56  ;;  %2505 = vmatprep.subr.bf16.mxu1 %v2659_v56  ;;  %v979_v49 = vpack.i.b16 %v978_v2, %v977_v46  ;;  %v1452_v4 = vpack.c.bf16 %v1436_v45, %v1436_v45 }
 0x52e   :  { %2212 = vmatprep.subr.bf16.mxu0 %v2560_v8 }
 0x52f   :  { %v1781_v61 = vsel %vm1457_vm10, %v979_v49, 0 }
 0x532   :  { %2502 = vmatmul.mubr.msk.bf16.vlgmr.msra.gmra.mrb[24].mxu0 %vm1349_vm9, %v1452_v4 }
 0x533   :  { %2496 = vmatmul.mubr.msk.bf16.vlgmr.msra.gmra.mrb[36].mxu1 %vm1349_vm9, %v1451_v60  ;;  %2244 = vmatprep.mubr.bf16.mxu0 %v2650_v1 }
 0x534   :  { %2506 = vmatpush3.bf16.msra.mxu1 %v1781_v61  ;;  %2507 = vmatprep.mubr.msk.bf16.mxu1 %vm2660_vm7, %v2659_v56  ;;  %v2561_v56 = vld [vmem:[%s3161_s4 + $0x10] ss:$8 sps:$4 sm:$0xff]  }
 0x535   :  { %2213 = vmatpush1.bf16.msra.mxu0 %v2558_v7 }
 0x536   :  { %2214 = vmatprep.subr.bf16.mxu0 %v2563_v9 }
 0x539   :  { %2215 = vmatpush1.bf16.msra.mxu0 %v2561_v56 }
 0x53a   :  { %2216 = vmatprep.subr.bf16.mxu0 %v2566_v10 }
 0x53b   :  { %2508 = vmatmul.mubr.msk.bf16.vlgmr.msra.gmra.mrb[40].mxu1 %vm1349_vm9, %v1453_v6 }
 0x53d   :  { %2217 = vmatpush1.bf16.msra.mxu0 %v2564_v12 }
 0x5d5   :  { %v1495_v55 = vpop.f32.mrb[12].mxu0 }
 0x5d6   :  { %v2467_v13 = vpop.f32.mrb[13].mxu0  ;;  %v1823_v21 = vpack.c.bf16 %v1495_v55, %v1495_v55 }
 0x5d7   :  { %v1498_v14 = vpop.f32.mrb[14].mxu0  ;;  %v1541_v15 = vpop.f32.mrb[28].mxu1 }
 0x5d8   :  { %v2468_v17 = vpop.f32.mrb[15].mxu0  ;;  %v2473_v18 = vpop.f32.mrb[29].mxu1  ;;  %v1830_v28 = vrot.slane %v1823_v21, %v2815_v11  ;;  %v1857_v32 = vpack.c.bf16 %v1541_v15, %v1541_v15 }
 0x5d9   :  { %v1544_v19 = vpop.f32.mrb[30].mxu1 }
 0x5da   :  { %v2474_v20 = vpop.f32.mrb[31].mxu1  ;;  %v1864_v39 = vrot.slane %v1857_v32, %v2815_v11 }
 0x5f5   :  { %v1587_v22 = vpop.f32.mrb[16].mxu0 }
 0x5f6   :  { %v1831_v24 = vpack.c.bf16 %v1587_v22, %v1587_v22  ;;  %v2479_v25 = vpop.f32.mrb[17].mxu0 }
 0x5f7   :  { %v1590_v27 = vpop.f32.mrb[18].mxu0 }
 0x5f8   :  { %v1838_v29 = vrot.slane %v1831_v24, %v2815_v11  ;;  %v2480_v30 = vpop.f32.mrb[19].mxu0 }
 0x5fa   :  { %v1839_v16 = vcombine.low %v1830_v28, %v1838_v29  ;;  %v1840_v31 = vcombine.high %v1830_v28, %v1838_v29 }
 0x5fc   :  { %v1847_v34 = vrot.slane %v1839_v16, %v2818_v23  ;;  %v1854_v50 = vrot.slane %v1840_v31, %v2818_v23 }
 0x5fd   :  { %v1679_v33 = vpop.f32.mrb[20].mxu0 }
 0x5fe   :  { %v1633_v36 = vpop.f32.mrb[32].mxu1  ;;  %v2491_v37 = vpop.f32.mrb[21].mxu0  ;;  %v1855_v42 = vcombine.high %v1847_v34, %v2650_v1  ;;  %v1891_v57 = vpack.c.bf16 %v1679_v33, %v1679_v33  ;;  %v1856_v58 = vcombine.high %v1854_v50, %v2650_v1  ;;  %v1963_v0 = vshrl.u32 %v1847_v34, 16 }
 0x5ff   :  { %v1865_v38 = vpack.c.bf16 %v1633_v36, %v1633_v36  ;;  %v2485_v26 = vpop.f32.mrb[33].mxu1  ;;  %v1682_v35 = vpop.f32.mrb[22].mxu0  ;;  %v1979_v5 = vshrl.u32 %v1854_v50, 16 }
 0x600   :  { %v1636_v47 = vpop.f32.mrb[34].mxu1  ;;  %v2492_v48 = vpop.f32.mrb[23].mxu0  ;;  %v1971_v3 = vshrl.u32 %v1855_v42, 16  ;;  %v1898_v9 = vrot.slane %v1891_v57, %v2815_v11  ;;  %v1987_v18 = vshrl.u32 %v1856_v58, 16 }
 0x601   :  { %v1872_v51 = vrot.slane %v1865_v38, %v2815_v11  ;;  %v2486_v52 = vpop.f32.mrb[35].mxu1 }
 0x603   :  { %v1873_v53 = vcombine.low %v1864_v39, %v1872_v51  ;;  %v1874_v54 = vcombine.high %v1864_v39, %v1872_v51 }
 0x605   :  { %v1881_v59 = vrot.slane %v1873_v53, %v2818_v23  ;;  %v1888_v62 = vrot.slane %v1874_v54, %v2818_v23  ;;  %v1771_v63 = vpop.f32.mrb[24].mxu0 }
 0x606   :  { %v1725_v45 = vpop.f32.mrb[36].mxu1  ;;  %v1899_v44 = vpack.c.bf16 %v1771_v63, %v1771_v63  ;;  %v2503_v2 = vpop.f32.mrb[25].mxu0 }
 0x607   :  { %v1889_v46 = vcombine.high %v1881_v59, %v2650_v1  ;;  %v1890_v49 = vcombine.high %v1888_v62, %v2650_v1  ;;  %v1961_v4 = vpack.i.b16 %v1881_v59, %v1847_v34  ;;  %v1964_v60 = vshrl.u32 %v1881_v59, 16  ;;  %v2497_v61 = vpop.f32.mrb[37].mxu1  ;;  %v1774_v6 = vpop.f32.mrb[26].mxu0 }
 0x608   :  { %v1977_v7 = vpack.i.b16 %v1888_v62, %v1854_v50  ;;  %v1980_v8 = vshrl.u32 %v1888_v62, 16  ;;  %v1906_v56 = vrot.slane %v1899_v44, %v2815_v11  ;;  %v1728_v10 = vpop.f32.mrb[38].mxu1  ;;  %v2504_v12 = vpop.f32.mrb[27].mxu0  ;;  %v1925_v16 = vpack.c.bf16 %v1725_v45, %v1725_v45 }
 0x609   :  { %v1965_v55 = vpack.i.b16 %v1964_v60, %v1963_v0  ;;  %v1969_v13 = vpack.i.b16 %v1889_v46, %v1855_v42  ;;  %v1972_v14 = vshrl.u32 %v1889_v46, 16  ;;  %v1985_v15 = vpack.i.b16 %v1890_v49, %v1856_v58  ;;  %v2498_v17 = vpop.f32.mrb[39].mxu1 }
 0x60a   :  { %v1981_v19 = vpack.i.b16 %v1980_v8, %v1979_v5  ;;  %v1988_v20 = vshrl.u32 %v1890_v49, 16  ;;  %v2023_v21 = vcombine.low %v1961_v4, %v1977_v7  ;;  %v1907_v24 = vcombine.low %v1898_v9, %v1906_v56  ;;  %v2567_v17 = vld [vmem:[%s3161_s4 + $0x30] ss:$8 sps:$4 sm:$0xff]  }
 0x60b   :  { %v1973_v22 = vpack.i.b16 %v1972_v14, %v1971_v3  ;;  %v1908_v25 = vcombine.high %v1898_v9, %v1906_v56  ;;  %v2031_v27 = vcombine.low %v1969_v13, %v1985_v15  ;;  %v1932_v39 = vrot.slane %v1925_v16, %v2815_v11 }
 0x60c   :  { %v1989_v28 = vpack.i.b16 %v1988_v20, %v1987_v18  ;;  %v2073_v29 = vcombine.low %v1965_v55, %v1981_v19  ;;  %v2030_v32 = vrot.slane %v2023_v21, %v2815_v11  ;;  %v1915_v47 = vrot.slane %v1907_v24, %v2818_v23  ;;  %v2569_v18 = vld [vmem:[%s3161_s4 + $0x34] ss:$8 sps:$4 sm:$0xff]   ;;  %s2663_s4 = smov [#allocation4]  }
 0x60d   :  { %v2038_v30 = vrot.slane %v2031_v27, %v2815_v11  ;;  %v1922_v52 = vrot.slane %v1908_v25, %v2818_v23  ;;  %2218 = vmatprep.subr.bf16.mxu0 %v2569_v18  ;;  %s2276_s25 = sshll.u32 %s2663_s4, 4  ;;  %s2277_s25 = int_to_ptr.vmem [resolvable:$true] %s2276_s25 }
 0x60e   :  { %v1817_v31 = vpop.f32.mrb[40].mxu1  ;;  %v2081_v33 = vcombine.low %v1973_v22, %v1989_v28  ;;  %v2080_v26 = vrot.slane %v2073_v29, %v2815_v11  ;;  %v1923_v54 = vcombine.high %v1915_v47, %v2650_v1  ;;  %v1995_v62 = vshrl.u32 %v1915_v47, 16  ;;  %2219 = vmatpush1.bf16.msra.mxu0 %v2567_v17  ;;  %s2602_s26 = scalar_lea.vmem %s2277_s25, 1024  ;;  %p2607_p1 = scmp.lt.s32.totalorder %s2277_s25, %s2277_s25 }
 0x60f   :  { %v2509_v34 = vpop.f32.mrb[41].mxu1  ;;  %v1933_v36 = vpack.c.bf16 %v1817_v31, %v1817_v31  ;;  %v2055_v38 = vcombine.low %v2030_v32, %v2038_v30  ;;  %v1924_v59 = vcombine.high %v1922_v52, %v2650_v1  ;;  %v2011_v44 = vshrl.u32 %v1922_v52, 16  ;;  %p2603_p0 = scmp.ne.s32.totalorder %s2277_s25, %s2602_s26  ;;  %p2608_p2 = scmp.lt.s32.totalorder %s2602_s26, %s2602_s26 }
 0x610   :  { %v1820_v37 = vpop.f32.mrb[42].mxu1  ;;  %v2088_v35 = vrot.slane %v2081_v33, %v2815_v11  ;;  %v2003_v45 = vshrl.u32 %v1923_v54, 16 }
 0x611   :  { %v2510_v48 = vpop.f32.mrb[43].mxu1  ;;  %v1940_v50 = vrot.slane %v1933_v36, %v2815_v11  ;;  %v2019_v6 = vshrl.u32 %v1924_v59, 16  ;;  %v2062_v21 = vrot.slane %v2055_v38, %v2818_v23  ;;  %p2609_p3 = por %p2608_p2, %p2607_p1 }
 0x612   :  { %v2105_v51 = vcombine.low %v2080_v26, %v2088_v35 }
 0x613   :  { %v1941_v42 = vcombine.low %v1932_v39, %v1940_v50  ;;  %v1942_v53 = vcombine.high %v1932_v39, %v1940_v50  ;;  %p2610_p4 = pnand %p2609_p3, %p2603_p0 }
 0x614   :  { %v2112_v28 = vrot.slane %v2105_v51, %v2818_v23 }
 0x615   :  { %v1949_v57 = vrot.slane %v1941_v42, %v2818_v23  ;;  %v1956_v58 = vrot.slane %v1942_v53, %v2818_v23 }
 0x617   :  { %v1957_v63 = vcombine.high %v1949_v57, %v2650_v1  ;;  %v1958_v0 = vcombine.high %v1956_v58, %v2650_v1  ;;  %v1993_v3 = vpack.i.b16 %v1949_v57, %v1915_v47  ;;  %v1996_v5 = vshrl.u32 %v1949_v57, 16 }
 0x618   :  { %v2009_v2 = vpack.i.b16 %v1956_v58, %v1922_v52  ;;  %v2012_v46 = vshrl.u32 %v1956_v58, 16 }
 0x619   :  { %v1997_v49 = vpack.i.b16 %v1996_v5, %v1995_v62  ;;  %v2001_v4 = vpack.i.b16 %v1957_v63, %v1923_v54  ;;  %v2004_v60 = vshrl.u32 %v1957_v63, 16  ;;  %v2017_v61 = vpack.i.b16 %v1958_v0, %v1924_v59 }
 0x61a   :  { %v2013_v7 = vpack.i.b16 %v2012_v46, %v2011_v44  ;;  %v2020_v8 = vshrl.u32 %v1958_v0, 16  ;;  %v2039_v9 = vcombine.low %v1993_v3, %v2009_v2 }
 0x61b   :  { %v2005_v56 = vpack.i.b16 %v2004_v60, %v2003_v45  ;;  %v2047_v10 = vcombine.low %v2001_v4, %v2017_v61 }
 0x61c   :  { %v2021_v12 = vpack.i.b16 %v2020_v8, %v2019_v6  ;;  %v2089_v55 = vcombine.low %v1997_v49, %v2013_v7  ;;  %v2046_v1 = vrot.slane %v2039_v9, %v2815_v11 }
 0x61d   :  { %v2054_v13 = vrot.slane %v2047_v10, %v2815_v11 }
 0x61e   :  { %v2097_v14 = vcombine.low %v2005_v56, %v2021_v12  ;;  %v2096_v19 = vrot.slane %v2089_v55, %v2815_v11 }
 0x61f   :  { %v2063_v15 = vcombine.low %v2046_v1, %v2054_v13 }
 0x620   :  { %v2104_v20 = vrot.slane %v2097_v14, %v2815_v11 }
 0x621   :  { %v2070_v22 = vrot.slane %v2063_v15, %v2818_v23 }
 0x622   :  { %v2113_v24 = vcombine.low %v2096_v19, %v2104_v20 }
 0x623   :  { %v2072_v25 = vcombine.high %v2062_v21, %v2070_v22  ;;  %v2071_v27 = vcombine.low %v2062_v21, %v2070_v22 }
 0x624   :  { %v2120_v29 = vrot.slane %v2113_v24, %v2818_v23 }
 0x625   :  { %v2126_v31 = vshrl.u32 %v2071_v27, 16  ;;  %v2132_v32 = vshrl.u32 %v2072_v25, 16 }
 0x626   :  { %v2122_v30 = vcombine.high %v2112_v28, %v2120_v29  ;;  %v2121_v16 = vcombine.low %v2112_v28, %v2120_v29 }
 0x628   :  { %v2131_v33 = vpack.i.b16 %v2122_v30, %v2072_v25  ;;  %v2127_v34 = vshrl.u32 %v2121_v16, 16  ;;  %v2133_v11 = vshrl.u32 %v2122_v30, 16  ;;  %v2125_v36 = vpack.i.b16 %v2121_v16, %v2071_v27 }
 0x62a   :  { %2137 = vrot.lane.b32.xlu0 %v2131_v33, %s2658_s10  ;;  %v2128_v37 = vpack.i.b16 %v2127_v34, %v2126_v31  ;;  %v2134_v38 = vpack.i.b16 %v2133_v11, %v2132_v32 }
 0x62c   :  { %2135 = vrot.lane.b32.xlu1 %v2128_v37, %s2656_s8 }
 0x630   :  { %2139 = vrot.lane.b32.xlu1 %v2134_v38, %s2654_s29 }
 0x69c   :  { %v2138_v23 = vpop.permute.xlu0 %2137 }
 0x69e   :  { %v2136_v26 = vpop.permute.xlu1 %2135 }
 0x69f   :  { %v2143_v35 = vsel %vm980_vm8, %v2125_v36, %v2136_v26 }
 0x6a0   :  { %v2146_v48 = vsel %vm2144_vm11, %v2143_v35, %v2138_v23 }
 0x6a2   :  { %v2140_v47 = vpop.permute.xlu1 %2139 }
 0x6a3   :  { %v2149_v39 = vsel %vm2147_vm12, %v2146_v48, %v2140_v47 }
 0x6a4   :  { %2360 = vmatmul.mubr.msk.bf16.vlgmr.msra.gmra.mrb[28].mxu0 %vm279_vm6, %v2149_v39 }
 0x6a5   :  { %2613 = shalt.err (!%p2610_p4)
}
 0x6a6   :  { %s2614_s2 = scalar_lea.hbm %s3164_s7, 1024 }
 0x6a7   :  { %p2615_p5 = scmp.ne.s32.totalorder %s3164_s7, %s2614_s2  ;;  %p2618_p6 = scmp.lt.u32.totalorder %s2614_s2, %s3164_s7 }
 0x6a9   :  { %p2620_p7 = pnand %p2618_p6, %p2615_p5 }
 0x6ab   :  { %2623 = shalt.err (!%p2620_p7)
}
 0x6ac   :  { %s2664_s10 = smov 128   ;;  %s2665_s11 = smov 8   ;;  %v2158_v50 = vld [vmem:[%s3162_s5] sm:$0x3] }
 0x6ad   :  { %2282 = dma.vmem_to_hbm [thread:$0]  %s2277_s25, 1024, %s3164_s7, [#allocation5], %s2664_s10, %s2664_s10, %s2665_s11   ;;  %v2163_v51 = vrot.slane %v2158_v50, %v231_v41  ;;  %v2167_v52 = vrot.slane %v2158_v50, %v235_v43 }
 0x6ae   :  { %s2666_s15 = smov [#allocation2]  }
 0x6af   :  { %s2264_s16 = sshll.u32 %s2666_s15, 4  ;;  %s2265_s16 = int_to_ptr.vmem [resolvable:$true] %s2264_s16 }
 0x6b0   :  { %s2624_s5 = scalar_lea.vmem %s2265_s16, 512  ;;  %p2629_p9 = scmp.lt.s32.totalorder %s2265_s16, %s2265_s16 }
 0x6b1   :  { %p2625_p8 = scmp.ne.s32.totalorder %s2265_s16, %s2624_s5  ;;  %p2630_p10 = scmp.lt.s32.totalorder %s2624_s5, %s2624_s5 }
 0x6b3   :  { %p2631_p11 = por %p2630_p10, %p2629_p9 }
 0x6b5   :  { %p2632_p12 = pnand %p2631_p11, %p2625_p8 }
 0x777   :  { %v2246_v42 = vpop.f32.mrb[28].mxu0 }
 0x778   :  { %v2247_v53 = vadd.f32 %v2246_v42, %v2163_v51  ;;  %v2248_v54 = vpop.f32.mrb[29].mxu0 }
 0x779   :  { %v2249_v57 = vadd.f32 %v2248_v54, %v2167_v52  ;;  %v2250_v58 = vpop.f32.mrb[30].mxu0 }
 0x77a   :  { %2255 = vst [vmem:[#allocation2] sm:$0xff] %v2247_v53  ;;  %v2251_v59 = vadd.f32 %v2250_v58, %v2163_v51  ;;  %v2252_v62 = vpop.f32.mrb[31].mxu0 }
 0x77b   :  { %2256 = vst [vmem:[#allocation2 + $0x8] sm:$0xff] %v2249_v57  ;;  %v2253_v63 = vadd.f32 %v2252_v62, %v2167_v52 }
 0x77c   :  { %2257 = vst [vmem:[#allocation2 + $0x10] sm:$0xff] %v2251_v59 }
 0x77d   :  { %2258 = vst [vmem:[#allocation2 + $0x18] sm:$0xff] %v2253_v63 }
 0x77e   :  { %2635 = shalt.err (!%p2632_p12)
}
 0x77f   :  { %s2636_s18 = scalar_lea.hbm %s3163_s6, 512 }
 0x780   :  { %p2637_p13 = scmp.ne.s32.totalorder %s3163_s6, %s2636_s18  ;;  %p2640_p0 = scmp.lt.u32.totalorder %s2636_s18, %s3163_s6 }
 0x782   :  { %p2642_p1 = pnand %p2640_p0, %p2637_p13 }
 0x784   :  { %2645 = shalt.err (!%p2642_p1)
}
 0x785   :  { %s2667_s22 = smov 256  }
 0x786   :  { %2270 = dma.vmem_to_hbm [thread:$0]  %s2265_s16, 512, %s3163_s6, [#allocation3], %s2667_s22, %s2667_s22, %s2656_s8  }
 0x787   :  { %2646 = dma.done.wait [#allocation3], 512  }
 0x788   :  { %2647 = vsyncadd [#allocation3], 4294966784 }
 0x789   :  { %2648 = dma.done.wait [#allocation5], 1024  }
 0x78a   :  { %2649 = vsyncadd [#allocation5], 4294966272 }
 0x78b   :  { %2289 = vsyncpa [#allocation3], 1 }
 0x78c   :  { %2290 = vsyncpa [#allocation5], 1 }

</bundles_post_ra>
